<compile_context>
chip_gen: v5e
topology: v5e:2x2
jax: 0.10.0
libtpu: 0.0.40
codegen_flags: <defaults>
</compile_context>

<pallas_src>
import functools

import jax
import jax.numpy as jnp
from jax.experimental import pallas as pl
from jax.experimental.pallas import tpu as pltpu

EPS = 1e-5
OUT_DIM = 12

_X_BLOCK_BUDGET = 10 * 1024 * 1024   # bytes per x tile, per pipeline buffer
_FUSE_X_BUDGET = 6 * 1024 * 1024     # keep whole x resident only below this


def _round_up(a, m):
    return (a + m - 1) // m * m


def _cdiv(a, b):
    return -(-a // b)


def _vmem_limit_bytes(need):
    # Generous headroom, but stay below v7x's 64 MiB physical VMEM.
    return int(max(min(need + (8 << 20), 56 << 20), 16 << 20))


def _pick_block_rows(n, d):
    """Batch tile sized by bytes, multiple of 8, >= 4 grid blocks when possible."""
    rows = max(_X_BLOCK_BUDGET // (d * 4), 8)
    rows = min(rows, _round_up(n, 8))
    if n >= 32:            # keep >= 4 blocks -> both v7x cores busy, pipeline steady state
        rows = min(rows, _round_up(_cdiv(n, 4), 8))
    return max(rows // 8 * 8, 8)


# ---------------------------------------------------------------------------
# Fused path: stats + BN + linear in ONE pass (x resident in VMEM).
# ---------------------------------------------------------------------------
def _fused_kernel(x_ref, gamma_ref, beta_ref, w_ref, b_ref, o_ref, *, inv_n):
    x = x_ref[...]                                            # (N, D) f32, resident
    mean = jnp.sum(x, axis=0, keepdims=True) * inv_n          # (1, D)
    xc = x - mean
    var = jnp.sum(xc * xc, axis=0, keepdims=True) * inv_n     # centred (biased) variance
    scale = gamma_ref[...] * jax.lax.rsqrt(var + EPS)         # EUP rsqrt
    xhat = xc * scale + beta_ref[...]
    o_ref[...] = (jnp.dot(xhat, w_ref[...], preferred_element_type=jnp.float32)
                  + b_ref[...]).astype(o_ref.dtype)


def _fused_bn_linear(x, gamma, beta, w_t, b):
    n, d = x.shape
    out_dim = w_t.shape[1]
    x_bytes = n * d * 4
    # x (possibly double-buffered) + centred/normalised temporaries + params + out.
    need = 6 * x_bytes + (2 * d + 2 * d * out_dim + 4 * out_dim + 2 * n * out_dim) * 4
    kernel = functools.partial(_fused_kernel, inv_n=1.0 / n)
    return pl.pallas_call(
        kernel,
        out_shape=jax.ShapeDtypeStruct((n, out_dim), jnp.float32),
        grid=(1,),
        in_specs=[pl.BlockSpec((n, d), lambda i: (0, 0)),
                  pl.BlockSpec((1, d), lambda i: (0, 0)),
                  pl.BlockSpec((1, d), lambda i: (0, 0)),
                  pl.BlockSpec((d, out_dim), lambda i: (0, 0)),
                  pl.BlockSpec((1, out_dim), lambda i: (0, 0))],
        out_specs=pl.BlockSpec((n, out_dim), lambda i: (0, 0)),
        compiler_params=pltpu.CompilerParams(
            dimension_semantics=("arbitrary",),
            vmem_limit_bytes=_vmem_limit_bytes(need)),
    )(x, gamma, beta, w_t, b)


# ---------------------------------------------------------------------------
# Streaming pass 1: per-feature batch statistics (first_bn and x too big).
# Grid (2, blocks_per_core): leading "parallel" axis splits the reduction over
# the two v7x TensorCores; each half owns its own (8, D) accumulator block.
# ---------------------------------------------------------------------------
def _stats_kernel(x_ref, sum_ref, sumsq_ref, *,
                  n_rows, block_rows, blocks_per_core):
    c = pl.program_id(0)                     # megacore half
    i = pl.program_id(1)                     # reduction step inside the half
    blk = c * blocks_per_core + i            # global (unclamped) batch-block index

    @pl.when(i == 0)
    def _init():
        sum_ref[...] = jnp.zeros_like(sum_ref)
        sumsq_ref[...] = jnp.zeros_like(sumsq_ref)

    x = x_ref[...]                           # (NB, D) f32

    def _accumulate(xv):
        sum_ref[0:1, :] += jnp.sum(xv, axis=0, keepdims=True)
        sumsq_ref[0:1, :] += jnp.sum(xv * xv, axis=0, keepdims=True)

    # Mask only blocks overhanging the real batch (also zeroes fully
    # out-of-range blocks whose DMA block index was clamped in the index_map).
    needs_mask = (blk + 1) * block_rows > n_rows

    @pl.when(needs_mask)
    def _masked():
        row = jax.lax.broadcasted_iota(jnp.int32, x.shape, 0) + blk * block_rows
        _accumulate(jnp.where(row < n_rows, x, 0.0))

    @pl.when(jnp.logical_not(needs_mask))
    def _fast():
        _accumulate(x)


def _bn_stats(x, *, block_rows):
    n, d = x.shape
    n_blocks = _cdiv(n, block_rows)
    blocks_per_core = _cdiv(n_blocks, 2)

    def x_map(c, i):
        # Clamp so a fully out-of-range block (odd block count) re-reads the
        # last valid block; its rows are masked to zero in the kernel.
        return (jnp.minimum(c * blocks_per_core + i, n_blocks - 1), 0)

    kernel = functools.partial(_stats_kernel, n_rows=n, block_rows=block_rows,
                               blocks_per_core=blocks_per_core)
    need = (2 * block_rows * d + 64 * d) * 4
    psum, psumsq = pl.pallas_call(
        kernel,
        out_shape=(jax.ShapeDtypeStruct((16, d), jnp.float32),
                   jax.ShapeDtypeStruct((16, d), jnp.float32)),
        grid=(2, blocks_per_core),
        in_specs=[pl.BlockSpec((block_rows, d), x_map)],
        out_specs=(pl.BlockSpec((8, d), lambda c, i: (c, 0)),
                   pl.BlockSpec((8, d), lambda c, i: (c, 0))),
        compiler_params=pltpu.CompilerParams(
            dimension_semantics=("parallel", "arbitrary"),
            vmem_limit_bytes=_vmem_limit_bytes(need)),
    )(x)
    # Tiny cross-core / cross-row merge in plain XLA.
    s = jnp.sum(psum, axis=0, keepdims=True)
    ss = jnp.sum(psumsq, axis=0, keepdims=True)
    return s, ss


# ---------------------------------------------------------------------------
# Streaming pass 2 / no-BN path: x @ W' + b' with VMEM-resident weights.
# ---------------------------------------------------------------------------
def _linear_kernel(x_ref, w_ref, b_ref, o_ref):
    o_ref[...] = (jnp.dot(x_ref[...], w_ref[...],
                          preferred_element_type=jnp.float32)
                  + b_ref[...]).astype(o_ref.dtype)


def _linear(x, w_eff, b_eff, *, block_rows):
    n, d = x.shape
    out_dim = w_eff.shape[1]
    need = (2 * block_rows * d + 2 * d * out_dim
            + 2 * block_rows * out_dim + 2 * out_dim) * 4
    # TODO(synk): mark w/b specs with pipeline_mode=pl.Buffered(1) (constant
    # index_map needs only one buffer) once that kwarg is confirmed available
    # in the deployed JAX version; also consider padding out_dim 12->128 for
    # unmasked stores (needs a wrapper-side slice, only pays off at large D).
    return pl.pallas_call(
        _linear_kernel,
        out_shape=jax.ShapeDtypeStruct((n, out_dim), jnp.float32),
        grid=(pl.cdiv(n, block_rows),),
        in_specs=[pl.BlockSpec((block_rows, d), lambda i: (i, 0)),
                  pl.BlockSpec((d, out_dim), lambda i: (0, 0)),
                  pl.BlockSpec((1, out_dim), lambda i: (0, 0))],
        out_specs=pl.BlockSpec((block_rows, out_dim), lambda i: (i, 0)),
        compiler_params=pltpu.CompilerParams(
            dimension_semantics=("parallel",),
            vmem_limit_bytes=_vmem_limit_bytes(need)),
    )(x, w_eff, b_eff)


# ---------------------------------------------------------------------------
# Forward wrapper.
# ---------------------------------------------------------------------------
def mlp1_forward(din, params, *, num_of_valid_rows, first_bn,
                 block_rows=None, fuse_vmem_budget=_FUSE_X_BUDGET):
    """din: (N, R, 96) float32 -> (N, 12) float32."""
    d = num_of_valid_rows * 96
    gamma, beta, w_t, b = params                       # (1,D), (1,D), (D,12), (1,12)

    x = din.reshape(-1, d)                             # glue reshape only; no pad, no HBM copy
    n = x.shape[0]

    if first_bn and n * d * 4 <= fuse_vmem_budget:
        # Single pass over x: stats + BN + matmul fused on the resident tile.
        return _fused_bn_linear(x, gamma, beta, w_t, b)

    nb = _pick_block_rows(n, d) if block_rows is None else block_rows

    if first_bn:
        # x doesn't fit on-chip: stream it twice (the BN scale sits on the
        # contraction axis, so two passes are algebraically unavoidable).
        s, ss = _bn_stats(x, block_rows=nb)
        inv_n = 1.0 / n
        mean = s * inv_n                               # (1, D)
        # TODO(synk): streaming path uses E[x^2]-E[x]^2 in f32; switch to a
        # shifted / Welford-style merge if |mean| >> std at production batches.
        var = jnp.maximum(ss * inv_n - mean * mean, 0.0)
        scale = gamma * jax.lax.rsqrt(var + EPS)       # (1, D)
        w_eff = w_t * scale.reshape(-1, 1)             # fold BN into the linear (tiny arrays)
        b_eff = b + (beta - mean * scale) @ w_t        # (1, 12)
    else:
        w_eff, b_eff = w_t, b

    return _linear(x, w_eff, b_eff, block_rows=nb)


def init_params(key, num_of_valid_rows):
    """Deterministic parameter init mirroring PyTorch defaults (shapes only)."""
    d = num_of_valid_rows * 96
    k_w, k_b = jax.random.split(key)
    bound = 1.0 / float(d) ** 0.5
    w = jax.random.uniform(k_w, (OUT_DIM, d), jnp.float32, -bound, bound)  # (out, in)
    b = jax.random.uniform(k_b, (OUT_DIM,), jnp.float32, -bound, bound)
    gamma = jnp.ones((1, d), jnp.float32)
    beta = jnp.zeros((1, d), jnp.float32)
    return gamma, beta, w.T, b.reshape(1, OUT_DIM)


def _reference(din, params, *, num_of_valid_rows, first_bn):
    gamma, beta, w_t, b = params
    x = din.reshape(-1, num_of_valid_rows * 96).astype(jnp.float32)
    if first_bn:
        mean = jnp.mean(x, axis=0, keepdims=True)
        var = jnp.mean((x - mean) ** 2, axis=0, keepdims=True)
        x = (x - mean) * jax.lax.rsqrt(var + EPS) * gamma + beta
    return x @ w_t + b


if __name__ == "__main__":
    key = jax.random.PRNGKey(0)
    k_p1, k_p2, k_x1, k_x2 = jax.random.split(key, 4)

    # Case 1: R=4 (D=384), BN on -> fused single-pass path.
    R1 = 4
    params1 = init_params(k_p1, R1)
    din1 = jax.random.normal(k_x1, (8, R1, 96), jnp.float32)
    out1 = jax.block_until_ready(
        mlp1_forward(din1, params1, num_of_valid_rows=R1, first_bn=True))
    ref1 = _reference(din1, params1, num_of_valid_rows=R1, first_bn=True)
    assert out1.shape == (8, OUT_DIM)
    assert jnp.allclose(out1, ref1, atol=1e-4, rtol=1e-4)

    # Case 2: BN off -> tiled linear only.
    out2 = jax.block_until_ready(
        mlp1_forward(din1, params1, num_of_valid_rows=R1, first_bn=False))
    ref2 = _reference(din1, params1, num_of_valid_rows=R1, first_bn=False)
    assert jnp.allclose(out2, ref2, atol=1e-4, rtol=1e-4)

    # Case 3: R=5 (D=480, NOT a multiple of 128 -> exercises the unpadded last
    # dim), BN on, fusion disabled to force the two-pass streaming path with a
    # megacore-split stats grid, partial last blocks and block-index clamping.
    R2 = 5
    params2 = init_params(k_p2, R2)
    din3 = jax.random.normal(k_x2, (20, R2, 96), jnp.float32)
    ref3 = _reference(din3, params2, num_of_valid_rows=R2, first_bn=True)
    out3 = jax.block_until_ready(
        mlp1_forward(din3, params2, num_of_valid_rows=R2, first_bn=True,
                     block_rows=8, fuse_vmem_budget=0))
    assert out3.shape == (20, OUT_DIM)
    assert jnp.allclose(out3, ref3, atol=1e-4, rtol=1e-4)

    # Case 4: same shapes through the fused path (default budget).
    out4 = jax.block_until_ready(
        mlp1_forward(din3, params2, num_of_valid_rows=R2, first_bn=True))
    assert jnp.allclose(out4, ref3, atol=1e-4, rtol=1e-4)

    print("KERNEL_OK")
</pallas_src>

<mosaic_0001>
module attributes {stable_mosaic.version = 11 : i64} {
  func.func @_fused_kernel(%arg0: i32, %arg1: memref<8x384xf32, #tpu.memory_space<vmem>>, %arg2: memref<1x384xf32, #tpu.memory_space<vmem>>, %arg3: memref<1x384xf32, #tpu.memory_space<vmem>>, %arg4: memref<384x12xf32, #tpu.memory_space<vmem>>, %arg5: memref<1x12xf32, #tpu.memory_space<vmem>>, %arg6: memref<8x12xf32, #tpu.memory_space<vmem>>) attributes {dimension_semantics = [#tpu.dimension_semantics<arbitrary>], iteration_bounds = array<i64: 1>, scalar_prefetch = 0 : i64, scratch_operands = 0 : i64, tpu.core_type = #tpu.core_type<tc>, window_params = [{pipeline_mode = #tpu.pipeline_mode<synchronous>, transform_indices = @transform_0, window_bounds = array<i64: 8, 384>}, {pipeline_mode = #tpu.pipeline_mode<synchronous>, transform_indices = @transform_1, window_bounds = array<i64: 1, 384>}, {pipeline_mode = #tpu.pipeline_mode<synchronous>, transform_indices = @transform_2, window_bounds = array<i64: 1, 384>}, {pipeline_mode = #tpu.pipeline_mode<synchronous>, transform_indices = @transform_3, window_bounds = array<i64: 384, 12>}, {pipeline_mode = #tpu.pipeline_mode<synchronous>, transform_indices = @transform_4, window_bounds = array<i64: 1, 12>}, {pipeline_mode = #tpu.pipeline_mode<synchronous>, transform_indices = @transform_5, window_bounds = array<i64: 8, 12>}]} {
    %c0 = arith.constant 0 : index
    %c0_0 = arith.constant 0 : index
    %0 = vector.load %arg1[%c0, %c0_0] : memref<8x384xf32, #tpu.memory_space<vmem>>, vector<8x384xf32>
    %cst = arith.constant dense<0.000000e+00> : vector<384xf32>
    %1 = vector.multi_reduction <add>, %0, %cst [0] : vector<8x384xf32> to vector<384xf32>
    %2 = vector.shape_cast %1 : vector<384xf32> to vector<1x384xf32>
    %cst_1 = arith.constant 1.250000e-01 : f32
    %3 = vector.broadcast %cst_1 : f32 to vector<1x384xf32>
    %4 = arith.mulf %2, %3 : vector<1x384xf32>
    %5 = vector.broadcast %4 : vector<1x384xf32> to vector<8x384xf32>
    %6 = arith.subf %0, %5 : vector<8x384xf32>
    %7 = arith.mulf %6, %6 : vector<8x384xf32>
    %cst_2 = arith.constant dense<0.000000e+00> : vector<384xf32>
    %8 = vector.multi_reduction <add>, %7, %cst_2 [0] : vector<8x384xf32> to vector<384xf32>
    %9 = vector.shape_cast %8 : vector<384xf32> to vector<1x384xf32>
    %cst_3 = arith.constant 1.250000e-01 : f32
    %10 = vector.broadcast %cst_3 : f32 to vector<1x384xf32>
    %11 = arith.mulf %9, %10 : vector<1x384xf32>
    %c0_4 = arith.constant 0 : index
    %c0_5 = arith.constant 0 : index
    %12 = vector.load %arg2[%c0_4, %c0_5] : memref<1x384xf32, #tpu.memory_space<vmem>>, vector<1x384xf32>
    %cst_6 = arith.constant 9.99999974E-6 : f32
    %13 = vector.broadcast %cst_6 : f32 to vector<1x384xf32>
    %14 = arith.addf %11, %13 : vector<1x384xf32>
    %15 = math.rsqrt %14 : vector<1x384xf32>
    %16 = arith.mulf %12, %15 : vector<1x384xf32>
    %17 = vector.broadcast %16 : vector<1x384xf32> to vector<8x384xf32>
    %18 = arith.mulf %6, %17 : vector<8x384xf32>
    %c0_7 = arith.constant 0 : index
    %c0_8 = arith.constant 0 : index
    %19 = vector.load %arg3[%c0_7, %c0_8] : memref<1x384xf32, #tpu.memory_space<vmem>>, vector<1x384xf32>
    %20 = vector.broadcast %19 : vector<1x384xf32> to vector<8x384xf32>
    %21 = arith.addf %18, %20 : vector<8x384xf32>
    %c0_9 = arith.constant 0 : index
    %c0_10 = arith.constant 0 : index
    %22 = vector.load %arg4[%c0_9, %c0_10] : memref<384x12xf32, #tpu.memory_space<vmem>>, vector<384x12xf32>
    %cst_11 = arith.constant dense<0.000000e+00> : vector<8x12xf32>
    %23 = tpu.matmul %21, %22, %cst_11 {dimension_numbers = #tpu.dot_dimension_numbers<[1], [0], [0], [1], [0, 0, 1, 1], [], []>} : vector<8x384xf32>, vector<384x12xf32>, vector<8x12xf32> -> vector<8x12xf32>
    %c0_12 = arith.constant 0 : index
    %c0_13 = arith.constant 0 : index
    %24 = vector.load %arg5[%c0_12, %c0_13] : memref<1x12xf32, #tpu.memory_space<vmem>>, vector<1x12xf32>
    %25 = vector.broadcast %24 : vector<1x12xf32> to vector<8x12xf32>
    %26 = arith.addf %23, %25 : vector<8x12xf32>
    %c0_14 = arith.constant 0 : index
    %c0_15 = arith.constant 0 : index
    %27 = vector.load %arg6[%c0_14, %c0_15] : memref<8x12xf32, #tpu.memory_space<vmem>>, vector<8x12xf32>
    tpu.vector_store %arg6[%c0_14, %c0_15], %26 {strides = array<i32>} : memref<8x12xf32, #tpu.memory_space<vmem>>, vector<8x12xf32>,
    return
  }
  func.func @transform_0(%arg0: i32) -> (i32, i32) {
    %c0_i32 = arith.constant 0 : i32
    %c0_i32_0 = arith.constant 0 : i32
    %c0_i32_1 = arith.constant 0 : i32
    return %c0_i32, %c0_i32_0 : i32, i32
  }
  func.func @transform_1(%arg0: i32) -> (i32, i32) {
    %c0_i32 = arith.constant 0 : i32
    %c0_i32_0 = arith.constant 0 : i32
    %c0_i32_1 = arith.constant 0 : i32
    return %c0_i32, %c0_i32_0 : i32, i32
  }
  func.func @transform_2(%arg0: i32) -> (i32, i32) {
    %c0_i32 = arith.constant 0 : i32
    %c0_i32_0 = arith.constant 0 : i32
    %c0_i32_1 = arith.constant 0 : i32
    return %c0_i32, %c0_i32_0 : i32, i32
  }
  func.func @transform_3(%arg0: i32) -> (i32, i32) {
    %c0_i32 = arith.constant 0 : i32
    %c0_i32_0 = arith.constant 0 : i32
    %c0_i32_1 = arith.constant 0 : i32
    return %c0_i32, %c0_i32_0 : i32, i32
  }
  func.func @transform_4(%arg0: i32) -> (i32, i32) {
    %c0_i32 = arith.constant 0 : i32
    %c0_i32_0 = arith.constant 0 : i32
    %c0_i32_1 = arith.constant 0 : i32
    return %c0_i32, %c0_i32_0 : i32, i32
  }
  func.func @transform_5(%arg0: i32) -> (i32, i32) {
    %c0_i32 = arith.constant 0 : i32
    %c0_i32_0 = arith.constant 0 : i32
    %c0_i32_1 = arith.constant 0 : i32
    return %c0_i32, %c0_i32_0 : i32, i32
  }
}

</mosaic_0001>

<bundles_post_ra>
// kernel: tpu_custom_call.1
= control target key start
LH: loop header
LB: loop body
LE: loop exit
PB: predicated region body
PF: predicated region fallthrough
CT: control target
= control target key end

     0   :  { %s534_s0 = inlined_call_operand.vmem [shape: f32[8,384], index: 0, kind: input, shape index: {}]   ;;  %s535_s1 = inlined_call_operand.vmem [shape: f32[1,384], index: 1, kind: input, shape index: {}]   ;;  %s536_s2 = inlined_call_operand.vmem [shape: f32[1,384], index: 2, kind: input, shape index: {}]   ;;  %s537_s3 = inlined_call_operand.vmem [shape: f32[384,12], index: 3, kind: input, shape index: {}]   ;;  %s538_s4 = inlined_call_operand.vmem [shape: f32[1,12], index: 4, kind: input, shape index: {}]   ;;  %s539_s5 = inlined_call_operand.hbm [shape: f32[8,12], index: 5, kind: output, shape index: {}]  }
   0x1   :  { %v185_v0 = vld [vmem:[%s537_s3 + $0x178] sm:$0xff]  ;;  %v184_v2 = vld [vmem:[%s537_s3 + $0x170] sm:$0xff]  ;;  %v183_v5 = vld [vmem:[%s537_s3 + $0x168] sm:$0xff] }
   0x2   :  { %v153_v1 = vld [vmem:[%s537_s3 + $0x78] sm:$0xff]  ;;  %230 = vmatpush.msra.mxu2 %v185_v0  ;;  %v152_v3 = vld [vmem:[%s537_s3 + $0x70] sm:$0xff]  ;;  %v151_v6 = vld [vmem:[%s537_s3 + $0x68] sm:$0xff] }
   0x3   :  { %190 = vmatpush.msra.mxu0 %v153_v1  ;;  %v169_v4 = vld [vmem:[%s537_s3 + $0xf8] sm:$0xff]  ;;  %v168_v7 = vld [vmem:[%s537_s3 + $0xf0] sm:$0xff]  ;;  %v167_v8 = vld [vmem:[%s537_s3 + $0xe8] sm:$0xff] }
   0x4   :  { %210 = vmatpush.msra.mxu1 %v169_v4  ;;  %231 = vmatpush.msra.mxu2 %v184_v2  ;;  %v182_v9 = vld [vmem:[%s537_s3 + $0x160] sm:$0xff]  ;;  %v181_v12 = vld [vmem:[%s537_s3 + $0x158] sm:$0xff]  ;;  %v180_v15 = vld [vmem:[%s537_s3 + $0x150] sm:$0xff] }
   0x5   :  { %191 = vmatpush.msra.mxu0 %v152_v3  ;;  %v150_v10 = vld [vmem:[%s537_s3 + $0x60] sm:$0xff]  ;;  %v149_v13 = vld [vmem:[%s537_s3 + $0x58] sm:$0xff]  ;;  %v148_v16 = vld [vmem:[%s537_s3 + $0x50] sm:$0xff] }
   0x6   :  { %211 = vmatpush.msra.mxu1 %v168_v7  ;;  %232 = vmatpush.msra.mxu2 %v183_v5  ;;  %v166_v11 = vld [vmem:[%s537_s3 + $0xe0] sm:$0xff]  ;;  %v165_v14 = vld [vmem:[%s537_s3 + $0xd8] sm:$0xff]  ;;  %v164_v17 = vld [vmem:[%s537_s3 + $0xd0] sm:$0xff] }
   0x7   :  { %192 = vmatpush.msra.mxu0 %v151_v6  ;;  %v179_v18 = vld [vmem:[%s537_s3 + $0x148] sm:$0xff]  ;;  %v178_v21 = vld [vmem:[%s537_s3 + $0x140] sm:$0xff]  ;;  %v177_v24 = vld [vmem:[%s537_s3 + $0x138] sm:$0xff] }
   0x8   :  { %212 = vmatpush.msra.mxu1 %v167_v8  ;;  %233 = vmatpush.msra.mxu2 %v182_v9  ;;  %v147_v19 = vld [vmem:[%s537_s3 + $0x48] sm:$0xff]  ;;  %v146_v22 = vld [vmem:[%s537_s3 + $0x40] sm:$0xff]  ;;  %v145_v25 = vld [vmem:[%s537_s3 + $0x38] sm:$0xff] }
   0x9   :  { %193 = vmatpush.msra.mxu0 %v150_v10  ;;  %v163_v20 = vld [vmem:[%s537_s3 + $0xc8] sm:$0xff]  ;;  %v162_v23 = vld [vmem:[%s537_s3 + $0xc0] sm:$0xff]  ;;  %v161_v26 = vld [vmem:[%s537_s3 + $0xb8] sm:$0xff] }
   0xa   :  { %213 = vmatpush.msra.mxu1 %v166_v11  ;;  %234 = vmatpush.msra.mxu2 %v181_v12  ;;  %v417_v27 = vld [vmem:[%s534_s0] sm:$0xff]  ;;  %v422_v28 = vld [vmem:[%s534_s0 + $0x8] sm:$0xff]  ;;  %v427_v29 = vld [vmem:[%s534_s0 + $0x10] sm:$0xff] }
   0xb   :  { %194 = vmatpush.msra.mxu0 %v149_v13  ;;  %v176_v30 = vld [vmem:[%s537_s3 + $0x130] sm:$0xff]  ;;  %v24_v32 = vrot.slane %v417_v27, 4  ;;  %v30_v33 = vrot.slane %v422_v28, 4  ;;  %v36_v34 = vrot.slane %v427_v29, 4 }
   0xc   :  { %214 = vmatpush.msra.mxu1 %v165_v14  ;;  %235 = vmatpush.msra.mxu2 %v180_v15  ;;  %v144_v31 = vld [vmem:[%s537_s3 + $0x30] sm:$0xff] }
   0xd   :  { %195 = vmatpush.msra.mxu0 %v148_v16  ;;  %v160_v35 = vld [vmem:[%s537_s3 + $0xb0] sm:$0xff] }
   0xe   :  { %215 = vmatpush.msra.mxu1 %v164_v17  ;;  %236 = vmatpush.msra.mxu2 %v179_v18 }
   0xf   :  { %196 = vmatpush.msra.mxu0 %v147_v19 }
  0x10   :  { %216 = vmatpush.msra.mxu1 %v163_v20  ;;  %237 = vmatpush.msra.mxu2 %v178_v21 }
  0x11   :  { %197 = vmatpush.msra.mxu0 %v146_v22 }
  0x12   :  { %217 = vmatpush.msra.mxu1 %v162_v23  ;;  %238 = vmatpush.msra.mxu2 %v177_v24 }
  0x13   :  { %198 = vmatpush.msra.mxu0 %v145_v25 }
  0x14   :  { %10 = vsyncpa [#allocation3], 0  ;;  %218 = vmatpush.msra.mxu1 %v161_v26  ;;  %v175_v36 = vld [vmem:[%s537_s3 + $0x128] sm:$0xff]  ;;  %v25_v38 = vadd.f32 %v24_v32, %v417_v27  ;;  %v31_v39 = vadd.f32 %v30_v33, %v422_v28  ;;  %v37_v40 = vadd.f32 %v36_v34, %v427_v29  ;;  %239 = vmatpush.msra.mxu2 %v176_v30  ;;  %v174_v42 = vld [vmem:[%s537_s3 + $0x120] sm:$0xff]  ;;  %vm111_vm9 = vcmask 1040384   ;;  %s302_s21 = smov [#allocation2]  }
  0x15   :  { %v143_v37 = vld [vmem:[%s537_s3 + $0x28] sm:$0xff]  ;;  %199 = vmatpush.msra.mxu0 %v144_v31  ;;  %v142_v43 = vld [vmem:[%s537_s3 + $0x20] sm:$0xff]  ;;  %v173_v48 = vld [vmem:[%s537_s3 + $0x118] sm:$0xff]  ;;  %vm113_vm10 = vcmask 1041408   ;;  %s257_s22 = sshll.u32 %s302_s21, 4  ;;  %s259_s25 = sshll.u32 %s539_s5, 4  ;;  %s258_s22 = int_to_ptr.vmem [resolvable:$true] %s257_s22  ;;  %s260_s25 = int_to_ptr.hbm [resolvable:$true] %s259_s25 }
  0x16   :  { %v159_v41 = vld [vmem:[%s537_s3 + $0xa8] sm:$0xff]  ;;  %219 = vmatpush.msra.mxu1 %v160_v35  ;;  %v26_v44 = vrot.slane %v25_v38, 2  ;;  %v32_v45 = vrot.slane %v31_v39, 2  ;;  %v38_v46 = vrot.slane %v37_v40, 2  ;;  %240 = vmatpush.msra.mxu2 %v175_v36  ;;  %v158_v47 = vld [vmem:[%s537_s3 + $0xa0] sm:$0xff]  ;;  %v141_v49 = vld [vmem:[%s537_s3 + $0x18] sm:$0xff] }
  0x17   :  { %200 = vmatpush.msra.mxu0 %v143_v37  ;;  %v157_v53 = vld [vmem:[%s537_s3 + $0x98] sm:$0xff]  ;;  %v172_v54 = vld [vmem:[%s537_s3 + $0x110] sm:$0xff]  ;;  %v171_v60 = vld [vmem:[%s537_s3 + $0x108] sm:$0xff]  ;;  %vm250_vm11 = vcmask 97280  }
  0x18   :  { %220 = vmatpush.msra.mxu1 %v159_v41  ;;  %v27_v50 = vadd.f32 %v26_v44, %v25_v38  ;;  %v33_v51 = vadd.f32 %v32_v45, %v31_v39  ;;  %v39_v52 = vadd.f32 %v38_v46, %v37_v40  ;;  %241 = vmatpush.msra.mxu2 %v174_v42  ;;  %v140_v55 = vld [vmem:[%s537_s3 + $0x10] sm:$0xff]  ;;  %v139_v61 = vld [vmem:[%s537_s3 + $0x8] sm:$0xff]  ;;  %v170_v1 = vld [vmem:[%s537_s3 + $0x100] sm:$0xff] }
  0x19   :  { %201 = vmatpush.msra.mxu0 %v142_v43  ;;  %v156_v59 = vld [vmem:[%s537_s3 + $0x90] sm:$0xff]  ;;  %v138_v35 = vld [vmem:[%s537_s3] sm:$0xff]  ;;  %v155_v36 = vld [vmem:[%s537_s3 + $0x88] sm:$0xff] }
  0x1a   :  { %221 = vmatpush.msra.mxu1 %v158_v47  ;;  %v28_v56 = vrot.slane %v27_v50, 1  ;;  %v34_v57 = vrot.slane %v33_v51, 1  ;;  %v40_v58 = vrot.slane %v39_v52, 1  ;;  %242 = vmatpush.msra.mxu2 %v173_v48  ;;  %v154_v37 = vld [vmem:[%s537_s3 + $0x80] sm:$0xff] }
  0x1b   :  { %202 = vmatpush.msra.mxu0 %v141_v49 }
  0x1c   :  { %222 = vmatpush.msra.mxu1 %v157_v53  ;;  %v29_v62 = vadd.f32 %v28_v56, %v27_v50  ;;  %v35_v63 = vadd.f32 %v34_v57, %v33_v51  ;;  %v41_v0 = vadd.f32 %v40_v58, %v39_v52  ;;  %243 = vmatpush.msra.mxu2 %v172_v54 }
  0x1d   :  { %203 = vmatpush.msra.mxu0 %v140_v55 }
  0x1e   :  { %223 = vmatpush.msra.mxu1 %v156_v59  ;;  %v42_v2 = vmul.f32 0.125, %v29_v62  ;;  %v43_v3 = vmul.f32 0.125, %v35_v63  ;;  %v44_v4 = vmul.f32 0.125, %v41_v0  ;;  %244 = vmatpush.msra.mxu2 %v171_v60  ;;  %v127_v0 = vld [vmem:[%s536_s2] sm:$0x7] }
  0x1f   :  { %204 = vmatpush.msra.mxu0 %v139_v61  ;;  %v72_v61 = vld [vmem:[%s535_s1] sm:$0x7] }
  0x20   :  { %v490_v5 = vsub.f32 %v417_v27, %v42_v2  ;;  %v493_v6 = vsub.f32 %v422_v28, %v43_v3  ;;  %v496_v7 = vsub.f32 %v427_v29, %v44_v4  ;;  %245 = vmatpush.msra.mxu2 %v170_v1  ;;  %224 = vmatpush.msra.mxu1 %v155_v36  ;;  %v131_v3 = vperm.slane %v127_v0, 2 }
  0x21   :  { %205 = vmatpush.msra.mxu0 %v138_v35  ;;  %v129_v4 = vperm.slane %v127_v0, 0 }
  0x22   :  { %v48_v8 = vmul.f32 %v490_v5, %v490_v5  ;;  %v49_v9 = vmul.f32 %v493_v6, %v493_v6  ;;  %v50_v10 = vmul.f32 %v496_v7, %v496_v7  ;;  %225 = vmatpush.msra.mxu1 %v154_v37 }
  0x24   :  { %v51_v11 = vrot.slane %v48_v8, 4  ;;  %v57_v12 = vrot.slane %v49_v9, 4  ;;  %v63_v13 = vrot.slane %v50_v10, 4 }
  0x26   :  { %v52_v14 = vadd.f32 %v51_v11, %v48_v8  ;;  %v58_v15 = vadd.f32 %v57_v12, %v49_v9  ;;  %v64_v16 = vadd.f32 %v63_v13, %v50_v10  ;;  %v130_v11 = vperm.slane %v127_v0, 1 }
  0x28   :  { %v53_v17 = vrot.slane %v52_v14, 2  ;;  %v59_v18 = vrot.slane %v58_v15, 2  ;;  %v65_v19 = vrot.slane %v64_v16, 2 }
  0x2a   :  { %v54_v20 = vadd.f32 %v53_v17, %v52_v14  ;;  %v60_v21 = vadd.f32 %v59_v18, %v58_v15  ;;  %v66_v22 = vadd.f32 %v65_v19, %v64_v16  ;;  %v269_v18 = vld [vmem:[%s538_s4] ss:$0 sm:$0xff] }
  0x2c   :  { %v55_v23 = vrot.slane %v54_v20, 1  ;;  %v61_v24 = vrot.slane %v60_v21, 1  ;;  %v67_v25 = vrot.slane %v66_v22, 1 }
  0x2e   :  { %v56_v26 = vadd.f32 %v55_v23, %v54_v20  ;;  %v62_v27 = vadd.f32 %v61_v24, %v60_v21  ;;  %v68_v28 = vadd.f32 %v67_v25, %v66_v22 }
  0x30   :  { %v69_v29 = vmul.f32 0.125, %v56_v26  ;;  %v70_v30 = vmul.f32 0.125, %v62_v27  ;;  %v71_v31 = vmul.f32 0.125, %v68_v28 }
  0x32   :  { %v73_v32 = vadd.f32 1e-05, %v69_v29  ;;  %v74_v33 = vadd.f32 1e-05, %v70_v30  ;;  %v75_v34 = vadd.f32 1e-05, %v71_v31 }
  0x34   :  { %270 = vrsqrt.f32 %v73_v32  ;;  %vm82_vm0 = vweird.f32 %v73_v32  ;;  %vm92_vm2 = vweird.f32 %v74_v33  ;;  %vm102_vm4 = vweird.f32 %v75_v34 }
  0x35   :  { %272 = vrsqrt.f32 %v74_v33 }
  0x36   :  { %274 = vrsqrt.f32 %v75_v34 }
  0x3a   :  { %v271_v38 = vpop.eup %270 }
  0x3b   :  { %v273_v39 = vpop.eup %272  ;;  %v77_v40 = vmul.f32 %v271_v38, %v73_v32  ;;  %vm83_vm1 = vweird.f32 %v271_v38 }
  0x3c   :  { %v275_v41 = vpop.eup %274  ;;  %v87_v42 = vmul.f32 %v273_v39, %v74_v33  ;;  %vm93_vm3 = vweird.f32 %v273_v39  ;;  %vm513_vm6 = vmor %vm82_vm0, %vm83_vm1 }
  0x3d   :  { %v78_v43 = vmul.f32 %v271_v38, %v77_v40  ;;  %v97_v44 = vmul.f32 %v275_v41, %v75_v34  ;;  %vm103_vm5 = vweird.f32 %v275_v41  ;;  %vm94_vm7 = vmor %vm92_vm2, %vm93_vm3 }
  0x3e   :  { %v88_v45 = vmul.f32 %v273_v39, %v87_v42  ;;  %vm104_vm8 = vmor %vm102_vm4, %vm103_vm5 }
  0x3f   :  { %v79_v46 = vmul.f32 0.5, %v78_v43  ;;  %v98_v47 = vmul.f32 %v275_v41, %v97_v44 }
  0x40   :  { %v89_v48 = vmul.f32 0.5, %v88_v45 }
  0x41   :  { %v80_v49 = vsub.f32 1.5, %v79_v46  ;;  %v99_v50 = vmul.f32 0.5, %v98_v47 }
  0x42   :  { %v90_v52 = vsub.f32 1.5, %v89_v48 }
  0x43   :  { %v81_v53 = vmul.f32 %v271_v38, %v80_v49  ;;  %v100_v54 = vsub.f32 1.5, %v99_v50 }
  0x44   :  { %v91_v55 = vmul.f32 %v273_v39, %v90_v52 }
  0x45   :  { %v101_v56 = vmul.f32 %v275_v41, %v100_v54  ;;  %v85_v57 = vsel %vm513_vm6, %v271_v38, %v81_v53 }
  0x46   :  { %v95_v58 = vsel %vm94_vm7, %v273_v39, %v91_v55 }
  0x47   :  { %v105_v59 = vsel %vm104_vm8, %v275_v41, %v101_v56  ;;  %v109_v60 = vrot.slane %v95_v58, 7 }
  0x48   :  { %v110_v62 = vrot.slane %v105_v59, 6 }
  0x49   :  { %v112_v63 = vsel %vm111_vm9, %v85_v57, %v109_v60 }
  0x4a   :  { %v114_v1 = vsel %vm113_vm10, %v112_v63, %v110_v62 }
  0x4b   :  { %v116_v2 = vmul.f32 %v114_v1, %v72_v61 }
  0x4d   :  { %v120_v8 = vperm.slane %v116_v2, 2  ;;  %v118_v9 = vperm.slane %v116_v2, 0  ;;  %v119_v10 = vperm.slane %v116_v2, 1 }
  0x4f   :  { %v126_v12 = vmul.f32 %v120_v8, %v496_v7  ;;  %v124_v13 = vmul.f32 %v118_v9, %v490_v5  ;;  %v125_v14 = vmul.f32 %v119_v10, %v493_v6 }
  0x51   :  { %v137_v15 = vadd.f32 %v131_v3, %v126_v12  ;;  %v135_v16 = vadd.f32 %v129_v4, %v124_v13  ;;  %v136_v17 = vadd.f32 %v130_v11, %v125_v14 }
  0x53   :  { %246 = vmatmul.f32.vlgmr.msra.gmra.mxu2 %v137_v15  ;;  %206 = vmatmul.f32.vlgmr.msra.gmra.mxu0 %v135_v16 }
  0x54   :  { %226 = vmatmul.f32.vlgmr.msra.gmra.mxu1 %v136_v17 }
  0xd0   :  { %v207_v19 = vpop.f32.mrf.mxu0 }
  0xd1   :  { %v208_v20 = vadd.f32 %v269_v18, %v207_v19  ;;  %v227_v21 = vpop.f32.mrf.mxu1 }
  0xd3   :  { %v228_v22 = vadd.f32 %v227_v21, %v208_v20 }
  0xd6   :  { %v247_v5 = vpop.f32.mrf.mxu2 }
  0xd7   :  { %v248_v6 = vadd.f32 %v247_v5, %v228_v22 }
  0xd9   :  { %251 = vst.msk [vmem:[#allocation2] sm:$0xff] %vm250_vm11, %v248_v6 }
  0xda   :  { %262 = dma.vmem_to_hbm [thread:$0]  %s258_s22, 128, %s260_s25, [#allocation3]  }
  0xdb   :  { %300 = dma.done.wait [#allocation3], 128  }
  0xdc   :  { %301 = vsyncadd [#allocation3], 4294967168 }
  0xdd   :  { %267 = vsyncpa [#allocation3], 1 }

</bundles_post_ra>
